<compile_context>
chip_gen: v6e
topology: v6e:2x2x1
jax: 0.10.0
libtpu: 0.0.40
codegen_flags: <defaults>
</compile_context>

<pallas_src>
import functools

import numpy as np
import jax
import jax.numpy as jnp
from jax.experimental import pallas as pl
from jax.experimental.pallas import tpu as pltpu

EPS = 1e-5  # PyTorch BatchNorm default eps


# ---------------------------------------------------------------------------
# Fused kernel: the entire network forward on one batch tile
# ---------------------------------------------------------------------------
def _fused_net_kernel(xp_ref, w1_ref, b1_ref, w2_ref, b2_ref, wf1_ref, b3_ref,
                      wf2_ref, b4_ref, o_ref, *, spatial, bt, proj):
    """Per grid step (bt batch rows):
       xp_ref : [spatial*bt, taps*Cin] bf16  gathered 3x3 patches (row = s*bt + n)
       w1_ref : [taps*Cin, taps*P]     bf16  block-diagonal conv1x1 weight (BN1 folded)
       w2_ref : [taps*P, P]            bf16  conv3x3 weight, torch row order (BN2 folded)
       wf1_ref: [spatial, P, P]        bf16  fc1 weight per (oh,ow) block (BN3 folded)
       wf2_ref: [P, cpad]              bf16  fc2 weight, lanes zero-padded to 128
       b*_ref : [1, *]                 f32   folded biases
       o_ref  : [bt, cpad]             f32   lane-dense output
    """
    # conv_1x1 (+BN+ReLU): all 9 taps in ONE MXU contraction via the
    # block-diagonal weight (no per-tap loop, no activation relayout).
    y1 = jnp.dot(xp_ref[...], w1_ref[...], preferred_element_type=jnp.float32)
    y1 = jnp.maximum(y1 + b1_ref[...], 0.0).astype(jnp.bfloat16)   # [spatial*bt, 9P]

    # conv_3x3/stride-2 (+BN+ReLU): one K=9P contraction (was 9 small matmuls).
    y2 = jnp.dot(y1, w2_ref[...], preferred_element_type=jnp.float32)
    y2 = jnp.maximum(y2 + b2_ref[...], 0.0)                        # [spatial*bt, P] f32
    y2b = y2.astype(jnp.bfloat16)                                  # single bf16 cast

    # fc1 (+BN+ReLU); Dropout(p=0.5) is identity in eval mode.
    # TODO(synk): training-mode dropout RNG not implemented (eval semantics).
    # Kept as 9 accumulated [bt,P]@[P,P] matmuls over contiguous, tile-aligned
    # slices: a single K=9P contraction would require a sublane->lane relayout
    # of y2 ((spatial*bt,P) -> (bt,spatial*P)) whose in-kernel lowering is not
    # guaranteed; at bt=8 these 9 pushes cost only a few hundred cycles.
    acc3 = jnp.zeros((bt, proj), jnp.float32)
    for s in range(spatial):
        acc3 = acc3 + jnp.dot(y2b[s * bt:(s + 1) * bt, :], wf1_ref[s],
                              preferred_element_type=jnp.float32)
    y3 = jnp.maximum(acc3 + b3_ref[...], 0.0).astype(jnp.bfloat16)  # [bt, P]

    # fc2 fused; output lanes padded to 128 -> unmasked, lane-dense vst.
    o_ref[...] = (jnp.dot(y3, wf2_ref[...], preferred_element_type=jnp.float32)
                  + b4_ref[...])


def _fused_forward(x_patch, w1bd, b1r, w2f, b2f, wf1f, b3f, wf2f, b4f,
                   *, spatial, bt, n_tiles, proj, cpad):
    kernel = functools.partial(_fused_net_kernel, spatial=spatial, bt=bt, proj=proj)
    rows_blk = spatial * bt

    def const_spec(shape):
        nd = len(shape)
        return pl.BlockSpec(shape, lambda i, _nd=nd: (0,) * _nd)

    # Advisory cost estimate so XLA can schedule the preceding gather sensibly.
    flops = 2 * n_tiles * (
        rows_blk * w1bd.shape[0] * w1bd.shape[1]      # block-diag conv1x1
        + rows_blk * w2f.shape[0] * w2f.shape[1]      # conv3x3 contraction
        + spatial * bt * proj * proj                  # fc1
        + bt * proj * cpad)                           # fc2
    bytes_accessed = sum(int(np.prod(a.shape)) * a.dtype.itemsize
                         for a in (x_patch, w1bd, b1r, w2f, b2f, wf1f, b3f,
                                   wf2f, b4f))
    bytes_accessed += n_tiles * bt * cpad * 4

    return pl.pallas_call(
        kernel,
        out_shape=jax.ShapeDtypeStruct((n_tiles * bt, cpad), jnp.float32),
        grid=(n_tiles,),
        in_specs=[
            # batch-tiled activations: block index moves with the grid
            pl.BlockSpec((rows_blk, x_patch.shape[1]), lambda i: (i, 0)),
            # weights/biases: constant block index -> fetched once, stay resident
            const_spec(w1bd.shape), const_spec(b1r.shape),
            const_spec(w2f.shape), const_spec(b2f.shape),
            const_spec(wf1f.shape), const_spec(b3f.shape),
            const_spec(wf2f.shape), const_spec(b4f.shape),
        ],
        out_specs=pl.BlockSpec((bt, cpad), lambda i: (i, 0)),
        compiler_params=pltpu.CompilerParams(
            dimension_semantics=("parallel",),        # v7x: shard batch tiles over 2 TCs
            vmem_limit_bytes=32 * 1024 * 1024),       # explicit (v5e default is 16 MiB)
        cost_estimate=pl.CostEstimate(flops=flops, transcendentals=0,
                                      bytes_accessed=bytes_accessed),
    )(x_patch, w1bd, b1r, w2f, b2f, wf1f, b3f, wf2f, b4f)


# ---------------------------------------------------------------------------
# Deterministic parameter init (shapes follow the PyTorch module __init__)
# ---------------------------------------------------------------------------
def init_params(key, input_dim, projection_dim, class_num):
    ks = jax.random.split(key, 22)
    P = projection_dim
    p = {}
    # conv_1x1: Conv2d(input_dim, P, 1x1) -> weight stored as [Cin, Cout]
    p["w1"] = 0.1 * jax.random.normal(ks[0], (input_dim, P), jnp.float32)
    p["b1"] = 0.1 * jax.random.normal(ks[1], (P,), jnp.float32)
    p["bn1_gamma"] = 1.0 + 0.05 * jax.random.normal(ks[2], (P,), jnp.float32)
    p["bn1_beta"] = 0.05 * jax.random.normal(ks[3], (P,), jnp.float32)
    p["bn1_mean"] = 0.05 * jax.random.normal(ks[4], (P,), jnp.float32)
    p["bn1_var"] = 1.0 + 0.05 * jax.random.uniform(ks[5], (P,), jnp.float32)
    # conv_3x3: Conv2d(P, P, 3x3, stride 2) -> weight stored [(kh*3+kw)*P + cin, cout]
    p["w2"] = 0.05 * jax.random.normal(ks[6], (3 * 3 * P, P), jnp.float32)
    p["b2"] = 0.1 * jax.random.normal(ks[7], (P,), jnp.float32)
    p["bn2_gamma"] = 1.0 + 0.05 * jax.random.normal(ks[8], (P,), jnp.float32)
    p["bn2_beta"] = 0.05 * jax.random.normal(ks[9], (P,), jnp.float32)
    p["bn2_mean"] = 0.05 * jax.random.normal(ks[10], (P,), jnp.float32)
    p["bn2_var"] = 1.0 + 0.05 * jax.random.uniform(ks[11], (P,), jnp.float32)
    # fc1: Linear(P*3*3, P) + BatchNorm1d(P); rows in torch flatten order c*9+s
    p["w_fc1"] = 0.05 * jax.random.normal(ks[12], (P * 3 * 3, P), jnp.float32)
    p["b_fc1"] = 0.1 * jax.random.normal(ks[13], (P,), jnp.float32)
    p["bn3_gamma"] = 1.0 + 0.05 * jax.random.normal(ks[14], (P,), jnp.float32)
    p["bn3_beta"] = 0.05 * jax.random.normal(ks[15], (P,), jnp.float32)
    p["bn3_mean"] = 0.05 * jax.random.normal(ks[16], (P,), jnp.float32)
    p["bn3_var"] = 1.0 + 0.05 * jax.random.uniform(ks[17], (P,), jnp.float32)
    # fc2: Linear(P, class_num)
    p["w_fc2"] = 0.1 * jax.random.normal(ks[18], (P, class_num), jnp.float32)
    p["b_fc2"] = 0.1 * jax.random.normal(ks[19], (class_num,), jnp.float32)
    return p


def _bn_fold(prev_bias, gamma, beta, mean, var):
    """Fold eval-mode BatchNorm + preceding bias into (scale, bias)."""
    scale = gamma / jnp.sqrt(var + EPS)
    bias = (prev_bias - mean) * scale + beta
    return scale, bias


# ---------------------------------------------------------------------------
# Forward pass: one-time weight folding / layout plumbing, then one kernel.
# ---------------------------------------------------------------------------
def relative_rotation_classifier(x_nchw, p):
    N, Cin, H, W = x_nchw.shape
    P = p["w1"].shape[1]
    C = p["w_fc2"].shape[1]

    assert (H - 3) % 2 == 0 and (W - 3) % 2 == 0, "valid 3x3/stride-2 conv needs odd H, W"
    Ho = (H - 3) // 2 + 1
    Wo = (W - 3) // 2 + 1
    assert Ho == 3 and Wo == 3, "fc1 expects projection_dim*3*3 features (spatial must reduce to 3x3)"

    taps = 9
    spatial = Ho * Wo
    bt = 8                                 # batch rows per grid step (sublane multiple)
    nb = -(-N // bt) * bt                  # padded batch
    n_tiles = nb // bt
    cpad = max(128, -(-C // 128) * 128)    # final output lanes padded to 128

    # ---- fold BN (eval) into per-channel scale/bias; fold scale into weights.
    s1, b1 = _bn_fold(p["b1"], p["bn1_gamma"], p["bn1_beta"], p["bn1_mean"], p["bn1_var"])
    s2, b2 = _bn_fold(p["b2"], p["bn2_gamma"], p["bn2_beta"], p["bn2_mean"], p["bn2_var"])
    s3, b3 = _bn_fold(p["b_fc1"], p["bn3_gamma"], p["bn3_beta"], p["bn3_mean"], p["bn3_var"])

    # conv1x1 weight as a block-diagonal [9*Cin, 9*P] so all 9 taps are one matmul.
    w1s = p["w1"] * s1[None, :]                                              # [Cin, P]
    w1bd = jnp.kron(jnp.eye(taps, dtype=w1s.dtype), w1s).astype(jnp.bfloat16)  # [9Cin, 9P]
    b1r = jnp.tile(b1, taps).reshape(1, taps * P).astype(jnp.float32)        # [1, 9P]
    # conv3x3 weight already in row order t*P + cin -> single K=9P contraction.
    w2f = (p["w2"] * s2[None, :]).astype(jnp.bfloat16)                       # [9P, P]
    b2f = b2.reshape(1, P).astype(jnp.float32)
    # fc1: permute rows from torch flatten order (c*9+s) to per-(oh,ow) blocks.
    wf1f = (p["w_fc1"].reshape(P, spatial, P).transpose(1, 0, 2)
            * s3[None, None, :]).astype(jnp.bfloat16)                        # [9, P, P]
    b3f = b3.reshape(1, P).astype(jnp.float32)
    wf2f = jnp.pad(p["w_fc2"], ((0, 0), (0, cpad - C))).astype(jnp.bfloat16) # [P, cpad]
    b4f = jnp.pad(p["b_fc2"], (0, cpad - C)).reshape(1, cpad).astype(jnp.float32)

    # ---- ONE fused gather (no transpose op): static indices fold NCHW layout,
    # 3x3 tap offsets, stride-2 output positions, and batch padding.
    # Row layout: row = tile*(spatial*bt) + s*bt + n_local; col = t*Cin + c.
    kh, kw = np.meshgrid(np.arange(3), np.arange(3), indexing="ij")
    oh, ow = np.meshgrid(np.arange(Ho), np.arange(Wo), indexing="ij")
    t_off = (kh * W + kw).reshape(taps)
    s_off = (2 * oh * W + 2 * ow).reshape(spatial)
    c_off = np.arange(Cin) * (H * W)
    n_off = np.minimum(np.arange(nb), N - 1) * (Cin * H * W)   # pad = repeat last sample
    idx = (n_off.reshape(n_tiles, 1, bt, 1, 1)
           + s_off.reshape(1, spatial, 1, 1, 1)
           + t_off.reshape(1, 1, 1, taps, 1)
           + c_off.reshape(1, 1, 1, 1, Cin)).reshape(
               n_tiles * spatial * bt, taps * Cin).astype(np.int32)
    x_patch = jnp.take(x_nchw.reshape(-1), idx, axis=0).astype(jnp.bfloat16)

    out_full = _fused_forward(x_patch, w1bd, b1r, w2f, b2f, wf1f, b3f, wf2f, b4f,
                              spatial=spatial, bt=bt, n_tiles=n_tiles,
                              proj=P, cpad=cpad)
    return out_full[:N, :C]


if __name__ == "__main__":
    key = jax.random.PRNGKey(0)
    k_x, k_p = jax.random.split(key)

    # Spatial must be 7x7 so the 3x3/stride-2 conv yields 3x3 (fc1 expects P*3*3).
    batch, input_dim, projection_dim, class_num = 2, 16, 32, 4
    H = W = 7

    x = jax.random.normal(k_x, (batch, input_dim, H, W), jnp.float32)  # NCHW like PyTorch
    params = init_params(k_p, input_dim, projection_dim, class_num)

    forward = jax.jit(relative_rotation_classifier)
    out = forward(x, params)
    out = jax.block_until_ready(out)
    assert out.shape == (batch, class_num)
    assert jnp.all(jnp.isfinite(out))
    print("KERNEL_OK")
</pallas_src>

<mosaic_0001>
module attributes {stable_mosaic.version = 11 : i64} {
  func.func @_fused_net_kernel(%arg0: i32, %arg1: memref<72x144xbf16, #tpu.memory_space<vmem>>, %arg2: memref<144x288xbf16, #tpu.memory_space<vmem>>, %arg3: memref<1x288xf32, #tpu.memory_space<vmem>>, %arg4: memref<288x32xbf16, #tpu.memory_space<vmem>>, %arg5: memref<1x32xf32, #tpu.memory_space<vmem>>, %arg6: memref<9x32x32xbf16, #tpu.memory_space<vmem>>, %arg7: memref<1x32xf32, #tpu.memory_space<vmem>>, %arg8: memref<32x128xbf16, #tpu.memory_space<vmem>>, %arg9: memref<1x128xf32, #tpu.memory_space<vmem>>, %arg10: memref<8x128xf32, #tpu.memory_space<vmem>>) attributes {dimension_semantics = [#tpu.dimension_semantics<parallel>], iteration_bounds = array<i64: 1>, scalar_prefetch = 0 : i64, scratch_operands = 0 : i64, tpu.core_type = #tpu.core_type<tc>, window_params = [{transform_indices = @transform_0, window_bounds = array<i64: 72, 144>}, {pipeline_mode = #tpu.pipeline_mode<synchronous>, transform_indices = @transform_1, window_bounds = array<i64: 144, 288>}, {pipeline_mode = #tpu.pipeline_mode<synchronous>, transform_indices = @transform_2, window_bounds = array<i64: 1, 288>}, {pipeline_mode = #tpu.pipeline_mode<synchronous>, transform_indices = @transform_3, window_bounds = array<i64: 288, 32>}, {pipeline_mode = #tpu.pipeline_mode<synchronous>, transform_indices = @transform_4, window_bounds = array<i64: 1, 32>}, {pipeline_mode = #tpu.pipeline_mode<synchronous>, transform_indices = @transform_5, window_bounds = array<i64: 9, 32, 32>}, {pipeline_mode = #tpu.pipeline_mode<synchronous>, transform_indices = @transform_6, window_bounds = array<i64: 1, 32>}, {pipeline_mode = #tpu.pipeline_mode<synchronous>, transform_indices = @transform_7, window_bounds = array<i64: 32, 128>}, {pipeline_mode = #tpu.pipeline_mode<synchronous>, transform_indices = @transform_8, window_bounds = array<i64: 1, 128>}, {transform_indices = @transform_9, window_bounds = array<i64: 8, 128>}]} {
    %c0 = arith.constant 0 : index
    %c0_0 = arith.constant 0 : index
    %0 = vector.load %arg1[%c0, %c0_0] : memref<72x144xbf16, #tpu.memory_space<vmem>>, vector<72x144xbf16>
    %c0_1 = arith.constant 0 : index
    %c0_2 = arith.constant 0 : index
    %1 = vector.load %arg2[%c0_1, %c0_2] : memref<144x288xbf16, #tpu.memory_space<vmem>>, vector<144x288xbf16>
    %cst = arith.constant dense<0.000000e+00> : vector<72x288xf32>
    %2 = tpu.matmul %0, %1, %cst {dimension_numbers = #tpu.dot_dimension_numbers<[1], [0], [0], [1], [0, 0, 1, 1], [], []>} : vector<72x144xbf16>, vector<144x288xbf16>, vector<72x288xf32> -> vector<72x288xf32>
    %c0_3 = arith.constant 0 : index
    %c0_4 = arith.constant 0 : index
    %3 = vector.load %arg3[%c0_3, %c0_4] : memref<1x288xf32, #tpu.memory_space<vmem>>, vector<1x288xf32>
    %4 = vector.broadcast %3 : vector<1x288xf32> to vector<72x288xf32>
    %5 = arith.addf %2, %4 : vector<72x288xf32>
    %cst_5 = arith.constant 0.000000e+00 : f32
    %6 = vector.broadcast %cst_5 : f32 to vector<72x288xf32>
    %7 = arith.maximumf %5, %6 : vector<72x288xf32>
    %8 = arith.truncf %7 : vector<72x288xf32> to vector<72x288xbf16>
    %c0_6 = arith.constant 0 : index
    %c0_7 = arith.constant 0 : index
    %9 = vector.load %arg4[%c0_6, %c0_7] : memref<288x32xbf16, #tpu.memory_space<vmem>>, vector<288x32xbf16>
    %cst_8 = arith.constant dense<0.000000e+00> : vector<72x32xf32>
    %10 = tpu.matmul %8, %9, %cst_8 {dimension_numbers = #tpu.dot_dimension_numbers<[1], [0], [0], [1], [0, 0, 1, 1], [], []>} : vector<72x288xbf16>, vector<288x32xbf16>, vector<72x32xf32> -> vector<72x32xf32>
    %c0_9 = arith.constant 0 : index
    %c0_10 = arith.constant 0 : index
    %11 = vector.load %arg5[%c0_9, %c0_10] : memref<1x32xf32, #tpu.memory_space<vmem>>, vector<1x32xf32>
    %12 = vector.broadcast %11 : vector<1x32xf32> to vector<72x32xf32>
    %13 = arith.addf %10, %12 : vector<72x32xf32>
    %cst_11 = arith.constant 0.000000e+00 : f32
    %14 = vector.broadcast %cst_11 : f32 to vector<72x32xf32>
    %15 = arith.maximumf %13, %14 : vector<72x32xf32>
    %16 = arith.truncf %15 : vector<72x32xf32> to vector<72x32xbf16>
    %cst_12 = arith.constant 0.000000e+00 : f32
    %17 = vector.broadcast %cst_12 : f32 to vector<8x32xf32>
    %18 = vector.extract_strided_slice %16 {offsets = [0, 0], sizes = [8, 32], strides = [1, 1]} : vector<72x32xbf16> to vector<8x32xbf16>
    %c0_13 = arith.constant 0 : index
    %c0_14 = arith.constant 0 : index
    %c0_15 = arith.constant 0 : index
    %19 = vector.load %arg6[%c0_13, %c0_14, %c0_15] : memref<9x32x32xbf16, #tpu.memory_space<vmem>>, vector<1x32x32xbf16>
    %20 = vector.shape_cast %19 : vector<1x32x32xbf16> to vector<32x32xbf16>
    %cst_16 = arith.constant dense<0.000000e+00> : vector<8x32xf32>
    %21 = tpu.matmul %18, %20, %cst_16 {dimension_numbers = #tpu.dot_dimension_numbers<[1], [0], [0], [1], [0, 0, 1, 1], [], []>} : vector<8x32xbf16>, vector<32x32xbf16>, vector<8x32xf32> -> vector<8x32xf32>
    %22 = arith.addf %17, %21 : vector<8x32xf32>
    %23 = vector.extract_strided_slice %16 {offsets = [8, 0], sizes = [8, 32], strides = [1, 1]} : vector<72x32xbf16> to vector<8x32xbf16>
    %c1 = arith.constant 1 : index
    %c0_17 = arith.constant 0 : index
    %c0_18 = arith.constant 0 : index
    %24 = vector.load %arg6[%c1, %c0_17, %c0_18] : memref<9x32x32xbf16, #tpu.memory_space<vmem>>, vector<1x32x32xbf16>
    %25 = vector.shape_cast %24 : vector<1x32x32xbf16> to vector<32x32xbf16>
    %cst_19 = arith.constant dense<0.000000e+00> : vector<8x32xf32>
    %26 = tpu.matmul %23, %25, %cst_19 {dimension_numbers = #tpu.dot_dimension_numbers<[1], [0], [0], [1], [0, 0, 1, 1], [], []>} : vector<8x32xbf16>, vector<32x32xbf16>, vector<8x32xf32> -> vector<8x32xf32>
    %27 = arith.addf %22, %26 : vector<8x32xf32>
    %28 = vector.extract_strided_slice %16 {offsets = [16, 0], sizes = [8, 32], strides = [1, 1]} : vector<72x32xbf16> to vector<8x32xbf16>
    %c2 = arith.constant 2 : index
    %c0_20 = arith.constant 0 : index
    %c0_21 = arith.constant 0 : index
    %29 = vector.load %arg6[%c2, %c0_20, %c0_21] : memref<9x32x32xbf16, #tpu.memory_space<vmem>>, vector<1x32x32xbf16>
    %30 = vector.shape_cast %29 : vector<1x32x32xbf16> to vector<32x32xbf16>
    %cst_22 = arith.constant dense<0.000000e+00> : vector<8x32xf32>
    %31 = tpu.matmul %28, %30, %cst_22 {dimension_numbers = #tpu.dot_dimension_numbers<[1], [0], [0], [1], [0, 0, 1, 1], [], []>} : vector<8x32xbf16>, vector<32x32xbf16>, vector<8x32xf32> -> vector<8x32xf32>
    %32 = arith.addf %27, %31 : vector<8x32xf32>
    %33 = vector.extract_strided_slice %16 {offsets = [24, 0], sizes = [8, 32], strides = [1, 1]} : vector<72x32xbf16> to vector<8x32xbf16>
    %c3 = arith.constant 3 : index
    %c0_23 = arith.constant 0 : index
    %c0_24 = arith.constant 0 : index
    %34 = vector.load %arg6[%c3, %c0_23, %c0_24] : memref<9x32x32xbf16, #tpu.memory_space<vmem>>, vector<1x32x32xbf16>
    %35 = vector.shape_cast %34 : vector<1x32x32xbf16> to vector<32x32xbf16>
    %cst_25 = arith.constant dense<0.000000e+00> : vector<8x32xf32>
    %36 = tpu.matmul %33, %35, %cst_25 {dimension_numbers = #tpu.dot_dimension_numbers<[1], [0], [0], [1], [0, 0, 1, 1], [], []>} : vector<8x32xbf16>, vector<32x32xbf16>, vector<8x32xf32> -> vector<8x32xf32>
    %37 = arith.addf %32, %36 : vector<8x32xf32>
    %38 = vector.extract_strided_slice %16 {offsets = [32, 0], sizes = [8, 32], strides = [1, 1]} : vector<72x32xbf16> to vector<8x32xbf16>
    %c4 = arith.constant 4 : index
    %c0_26 = arith.constant 0 : index
    %c0_27 = arith.constant 0 : index
    %39 = vector.load %arg6[%c4, %c0_26, %c0_27] : memref<9x32x32xbf16, #tpu.memory_space<vmem>>, vector<1x32x32xbf16>
    %40 = vector.shape_cast %39 : vector<1x32x32xbf16> to vector<32x32xbf16>
    %cst_28 = arith.constant dense<0.000000e+00> : vector<8x32xf32>
    %41 = tpu.matmul %38, %40, %cst_28 {dimension_numbers = #tpu.dot_dimension_numbers<[1], [0], [0], [1], [0, 0, 1, 1], [], []>} : vector<8x32xbf16>, vector<32x32xbf16>, vector<8x32xf32> -> vector<8x32xf32>
    %42 = arith.addf %37, %41 : vector<8x32xf32>
    %43 = vector.extract_strided_slice %16 {offsets = [40, 0], sizes = [8, 32], strides = [1, 1]} : vector<72x32xbf16> to vector<8x32xbf16>
    %c5 = arith.constant 5 : index
    %c0_29 = arith.constant 0 : index
    %c0_30 = arith.constant 0 : index
    %44 = vector.load %arg6[%c5, %c0_29, %c0_30] : memref<9x32x32xbf16, #tpu.memory_space<vmem>>, vector<1x32x32xbf16>
    %45 = vector.shape_cast %44 : vector<1x32x32xbf16> to vector<32x32xbf16>
    %cst_31 = arith.constant dense<0.000000e+00> : vector<8x32xf32>
    %46 = tpu.matmul %43, %45, %cst_31 {dimension_numbers = #tpu.dot_dimension_numbers<[1], [0], [0], [1], [0, 0, 1, 1], [], []>} : vector<8x32xbf16>, vector<32x32xbf16>, vector<8x32xf32> -> vector<8x32xf32>
    %47 = arith.addf %42, %46 : vector<8x32xf32>
    %48 = vector.extract_strided_slice %16 {offsets = [48, 0], sizes = [8, 32], strides = [1, 1]} : vector<72x32xbf16> to vector<8x32xbf16>
    %c6 = arith.constant 6 : index
    %c0_32 = arith.constant 0 : index
    %c0_33 = arith.constant 0 : index
    %49 = vector.load %arg6[%c6, %c0_32, %c0_33] : memref<9x32x32xbf16, #tpu.memory_space<vmem>>, vector<1x32x32xbf16>
    %50 = vector.shape_cast %49 : vector<1x32x32xbf16> to vector<32x32xbf16>
    %cst_34 = arith.constant dense<0.000000e+00> : vector<8x32xf32>
    %51 = tpu.matmul %48, %50, %cst_34 {dimension_numbers = #tpu.dot_dimension_numbers<[1], [0], [0], [1], [0, 0, 1, 1], [], []>} : vector<8x32xbf16>, vector<32x32xbf16>, vector<8x32xf32> -> vector<8x32xf32>
    %52 = arith.addf %47, %51 : vector<8x32xf32>
    %53 = vector.extract_strided_slice %16 {offsets = [56, 0], sizes = [8, 32], strides = [1, 1]} : vector<72x32xbf16> to vector<8x32xbf16>
    %c7 = arith.constant 7 : index
    %c0_35 = arith.constant 0 : index
    %c0_36 = arith.constant 0 : index
    %54 = vector.load %arg6[%c7, %c0_35, %c0_36] : memref<9x32x32xbf16, #tpu.memory_space<vmem>>, vector<1x32x32xbf16>
    %55 = vector.shape_cast %54 : vector<1x32x32xbf16> to vector<32x32xbf16>
    %cst_37 = arith.constant dense<0.000000e+00> : vector<8x32xf32>
    %56 = tpu.matmul %53, %55, %cst_37 {dimension_numbers = #tpu.dot_dimension_numbers<[1], [0], [0], [1], [0, 0, 1, 1], [], []>} : vector<8x32xbf16>, vector<32x32xbf16>, vector<8x32xf32> -> vector<8x32xf32>
    %57 = arith.addf %52, %56 : vector<8x32xf32>
    %58 = vector.extract_strided_slice %16 {offsets = [64, 0], sizes = [8, 32], strides = [1, 1]} : vector<72x32xbf16> to vector<8x32xbf16>
    %c8 = arith.constant 8 : index
    %c0_38 = arith.constant 0 : index
    %c0_39 = arith.constant 0 : index
    %59 = vector.load %arg6[%c8, %c0_38, %c0_39] : memref<9x32x32xbf16, #tpu.memory_space<vmem>>, vector<1x32x32xbf16>
    %60 = vector.shape_cast %59 : vector<1x32x32xbf16> to vector<32x32xbf16>
    %cst_40 = arith.constant dense<0.000000e+00> : vector<8x32xf32>
    %61 = tpu.matmul %58, %60, %cst_40 {dimension_numbers = #tpu.dot_dimension_numbers<[1], [0], [0], [1], [0, 0, 1, 1], [], []>} : vector<8x32xbf16>, vector<32x32xbf16>, vector<8x32xf32> -> vector<8x32xf32>
    %62 = arith.addf %57, %61 : vector<8x32xf32>
    %c0_41 = arith.constant 0 : index
    %c0_42 = arith.constant 0 : index
    %63 = vector.load %arg7[%c0_41, %c0_42] : memref<1x32xf32, #tpu.memory_space<vmem>>, vector<1x32xf32>
    %64 = vector.broadcast %63 : vector<1x32xf32> to vector<8x32xf32>
    %65 = arith.addf %62, %64 : vector<8x32xf32>
    %cst_43 = arith.constant 0.000000e+00 : f32
    %66 = vector.broadcast %cst_43 : f32 to vector<8x32xf32>
    %67 = arith.maximumf %65, %66 : vector<8x32xf32>
    %68 = arith.truncf %67 : vector<8x32xf32> to vector<8x32xbf16>
    %c0_44 = arith.constant 0 : index
    %c0_45 = arith.constant 0 : index
    %69 = vector.load %arg8[%c0_44, %c0_45] : memref<32x128xbf16, #tpu.memory_space<vmem>>, vector<32x128xbf16>
    %cst_46 = arith.constant dense<0.000000e+00> : vector<8x128xf32>
    %70 = tpu.matmul %68, %69, %cst_46 {dimension_numbers = #tpu.dot_dimension_numbers<[1], [0], [0], [1], [0, 0, 1, 1], [], []>} : vector<8x32xbf16>, vector<32x128xbf16>, vector<8x128xf32> -> vector<8x128xf32>
    %c0_47 = arith.constant 0 : index
    %c0_48 = arith.constant 0 : index
    %71 = vector.load %arg9[%c0_47, %c0_48] : memref<1x128xf32, #tpu.memory_space<vmem>>, vector<1x128xf32>
    %72 = vector.broadcast %71 : vector<1x128xf32> to vector<8x128xf32>
    %73 = arith.addf %70, %72 : vector<8x128xf32>
    %c0_49 = arith.constant 0 : index
    %c0_50 = arith.constant 0 : index
    %74 = vector.load %arg10[%c0_49, %c0_50] : memref<8x128xf32, #tpu.memory_space<vmem>>, vector<8x128xf32>
    tpu.vector_store %arg10[%c0_49, %c0_50], %73 {strides = array<i32>} : memref<8x128xf32, #tpu.memory_space<vmem>>, vector<8x128xf32>,
    return
  }
  func.func @transform_0(%arg0: i32) -> (i32, i32) {
    %c0_i32 = arith.constant 0 : i32
    %c0_i32_0 = arith.constant 0 : i32
    return %arg0, %c0_i32 : i32, i32
  }
  func.func @transform_1(%arg0: i32) -> (i32, i32) {
    %c0_i32 = arith.constant 0 : i32
    %c0_i32_0 = arith.constant 0 : i32
    %c0_i32_1 = arith.constant 0 : i32
    return %c0_i32, %c0_i32_0 : i32, i32
  }
  func.func @transform_2(%arg0: i32) -> (i32, i32) {
    %c0_i32 = arith.constant 0 : i32
    %c0_i32_0 = arith.constant 0 : i32
    %c0_i32_1 = arith.constant 0 : i32
    return %c0_i32, %c0_i32_0 : i32, i32
  }
  func.func @transform_3(%arg0: i32) -> (i32, i32) {
    %c0_i32 = arith.constant 0 : i32
    %c0_i32_0 = arith.constant 0 : i32
    %c0_i32_1 = arith.constant 0 : i32
    return %c0_i32, %c0_i32_0 : i32, i32
  }
  func.func @transform_4(%arg0: i32) -> (i32, i32) {
    %c0_i32 = arith.constant 0 : i32
    %c0_i32_0 = arith.constant 0 : i32
    %c0_i32_1 = arith.constant 0 : i32
    return %c0_i32, %c0_i32_0 : i32, i32
  }
  func.func @transform_5(%arg0: i32) -> (i32, i32, i32) {
    %c0_i32 = arith.constant 0 : i32
    %c0_i32_0 = arith.constant 0 : i32
    %c0_i32_1 = arith.constant 0 : i32
    %c0_i32_2 = arith.constant 0 : i32
    return %c0_i32, %c0_i32_0, %c0_i32_1 : i32, i32, i32
  }
  func.func @transform_6(%arg0: i32) -> (i32, i32) {
    %c0_i32 = arith.constant 0 : i32
    %c0_i32_0 = arith.constant 0 : i32
    %c0_i32_1 = arith.constant 0 : i32
    return %c0_i32, %c0_i32_0 : i32, i32
  }
  func.func @transform_7(%arg0: i32) -> (i32, i32) {
    %c0_i32 = arith.constant 0 : i32
    %c0_i32_0 = arith.constant 0 : i32
    %c0_i32_1 = arith.constant 0 : i32
    return %c0_i32, %c0_i32_0 : i32, i32
  }
  func.func @transform_8(%arg0: i32) -> (i32, i32) {
    %c0_i32 = arith.constant 0 : i32
    %c0_i32_0 = arith.constant 0 : i32
    %c0_i32_1 = arith.constant 0 : i32
    return %c0_i32, %c0_i32_0 : i32, i32
  }
  func.func @transform_9(%arg0: i32) -> (i32, i32) {
    %c0_i32 = arith.constant 0 : i32
    %c0_i32_0 = arith.constant 0 : i32
    return %arg0, %c0_i32 : i32, i32
  }
}

</mosaic_0001>

<bundles_post_ra>
// kernel: tile.8
= control target key start
LH: loop header
LB: loop body
LE: loop exit
PB: predicated region body
PF: predicated region fallthrough
CT: control target
= control target key end

     0   :  { %s28_s0 = inlined_call_operand.vmem [shape: f32[32], index: 0, kind: input, shape index: {}]   ;;  %s29_s1 = inlined_call_operand.vmem [shape: f32[9,32], index: 1, kind: output, shape index: {}]  }
   0x1   :  { %v4_v0 = vld [vmem:[%s28_s0] ss:$0 sm:$0xff] }
   0x2   :  { %5 = vst [vmem:[%s29_s1] sm:$0xff] %v4_v0  ;;  %8 = vst [vmem:[%s29_s1 + $0x8] sm:$0xff] %v4_v0 }

// kernel: tile.9
= control target key start
LH: loop header
LB: loop body
LE: loop exit
PB: predicated region body
PF: predicated region fallthrough
CT: control target
= control target key end

     0   :  { %s6_s6 = smov 3  ;;  %s13_s11 = smov 3  ;;  %vm3_vm0 = vcmask 261120   ;;  %vm10_vm1 = vcmask 1048320   ;;  %vm17_vm2 = vcmask 785920   ;;  %vm24_vm3 = vcmask 523520   ;;  %s90_s0 = inlined_call_operand.vmem [shape: f32[9,32], index: 0, kind: input, shape index: {}]   ;;  %s91_s1 = inlined_call_operand.vmem [shape: f32[1,288], index: 1, kind: output, shape index: {}]  }
   0x1   :  { %v2_v0 = vld [vmem:[%s90_s0] ss:$4 sm:$0x7]   ;;  %v48_v1 = vld [vmem:[%s90_s0 + $0x3] ss:$4 sm:%s6_s6]   ;;  %s56_s12 = smov 96  }
   0x2   :  { %8 = vrot.lane.b32.xlu0 %v48_v1, %s56_s12  ;;  %s20_s13 = smov 3  ;;  %4 = vst.msk [vmem:[#allocation0] ss:$8 sm:$0x7] %vm3_vm0, %v2_v0   ;;  %v49_v2 = vld [vmem:[%s90_s0 + $0x2] ss:$4 sm:%s13_s11]  }
   0x3   :  { %v50_v3 = vld [vmem:[%s90_s0 + $0x1] ss:$4 sm:%s20_s13]   ;;  %s57_s0 = smov 32   ;;  %s58_s18 = smov 64  }
   0x4   :  { %22 = vrot.lane.b32.xlu1 %v50_v3, %s57_s0 }
   0x6   :  { %15 = vrot.lane.b32.xlu0 %v49_v2, %s58_s18 }
   0x9   :  { %v41_v4 = vld [vmem:[#allocation0 + $0x10] sm:$0x1] }
   0xa   :  { %52 = vst [vmem:[%s91_s1 + $0x2] sm:$0x1] %v41_v4 }
  0x74   :  { %v9_v5 = vpop.permute.xlu0 %8  }
  0x75   :  { %11 = vst.msk [vmem:[#allocation0] ss:$8 sm:$0x3] %vm10_vm1, %v9_v5  }
  0x76   :  { %v23_v6 = vpop.permute.xlu1 %22  }
  0x78   :  { %v16_v7 = vpop.permute.xlu0 %15  }
  0x79   :  { %18 = vst.msk [vmem:[#allocation0] ss:$8 sm:$0x3] %vm17_vm2, %v16_v7  }
  0x7a   :  { %25 = vst.msk [vmem:[#allocation0] ss:$8 sm:$0x3] %vm24_vm3, %v23_v6  }
  0x81   :  { %v30_v8 = vld [vmem:[#allocation0] sm:$0x1]  ;;  %v35_v9 = vld [vmem:[#allocation0 + $0x8] sm:$0x1] }
  0x82   :  { %33 = vst [vmem:[%s91_s1] sm:$0x1] %v30_v8  ;;  %51 = vst [vmem:[%s91_s1 + $0x1] sm:$0x1] %v35_v9 }

// kernel: relative_rotation_classifier.1
= control target key start
LH: loop header
LB: loop body
LE: loop exit
PB: predicated region body
PF: predicated region fallthrough
CT: control target
= control target key end

     0   :  { %v1865_v0 = vmov 0   ;;  %vm281_vm0 = vcmask 130048   ;;  %v1866_v34 = vmov 0.0   ;;  %vm1867_vm1 = vmmov 0   ;;  %s2285_s1 = inlined_call_operand.vmem [shape: bf16[144,288], index: 1, kind: input, shape index: {}]   ;;  %s2286_s0 = inlined_call_operand.vmem [shape: bf16[72,144], index: 0, kind: input, shape index: {}]   ;;  %s2287_s3 = inlined_call_operand.vmem [shape: bf16[288,32], index: 3, kind: input, shape index: {}]   ;;  %s2288_s5 = inlined_call_operand.vmem [shape: bf16[9,32,32], index: 5, kind: input, shape index: {}]   ;;  %s2289_s2 = inlined_call_operand.vmem [shape: f32[1,288], index: 2, kind: input, shape index: {}]   ;;  %s2290_s4 = inlined_call_operand.vmem [shape: f32[1,32], index: 4, kind: input, shape index: {}]   ;;  %s2291_s7 = inlined_call_operand.vmem [shape: bf16[32,128], index: 7, kind: input, shape index: {}]   ;;  %s2292_s6 = inlined_call_operand.vmem [shape: f32[1,32], index: 6, kind: input, shape index: {}]   ;;  %s2293_s8 = inlined_call_operand.vmem [shape: f32[1,128], index: 8, kind: input, shape index: {}]   ;;  %s2294_s9 = inlined_call_operand.vmem [shape: f32[8,128], index: 9, kind: output, shape index: {}]  }
   0x1   :  { %378 = vmatprep.subr.bf16.mxu1 %v1865_v0  ;;  %v1777_v1 = vld [vmem:[%s2285_s1 + $0xac] ss:$12 sps:$4 sm:$0xff]   ;;  %v1779_v2 = vld [vmem:[%s2285_s1 + $0xb0] ss:$12 sps:$4 sm:$0xff]   ;;  %v1780_v3 = vld [vmem:[%s2285_s1 + $0xa8] ss:$12 sps:$4 sm:$0xff]   ;;  %v80_v58 = vlaneseq }
   0x2   :  { %297 = vmatprep.subr.bf16.mxu0 %v1777_v1  ;;  %379 = vmatpush1.bf16.msra.mxu1 %v1779_v2  ;;  %v1781_v4 = vld [vmem:[%s2285_s1 + $0x94] ss:$12 sps:$4 sm:$0xff]   ;;  %v1783_v5 = vld [vmem:[%s2285_s1 + $0x98] ss:$12 sps:$4 sm:$0xff]   ;;  %v1784_v6 = vld [vmem:[%s2285_s1 + $0x90] ss:$12 sps:$4 sm:$0xff]  }
   0x3   :  { %298 = vmatpush1.bf16.msra.mxu0 %v1780_v3  ;;  %380 = vmatprep.subr.bf16.mxu1 %v1865_v0  ;;  %v1785_v7 = vld [vmem:[%s2285_s1 + $0x7c] ss:$12 sps:$4 sm:$0xff]   ;;  %v1787_v8 = vld [vmem:[%s2285_s1 + $0x80] ss:$12 sps:$4 sm:$0xff]   ;;  %v1788_v9 = vld [vmem:[%s2285_s1 + $0x78] ss:$12 sps:$4 sm:$0xff]  }
   0x4   :  { %299 = vmatprep.subr.bf16.mxu0 %v1781_v4  ;;  %v1789_v10 = vld [vmem:[%s2285_s1 + $0x64] ss:$12 sps:$4 sm:$0xff]   ;;  %v1791_v11 = vld [vmem:[%s2285_s1 + $0x68] ss:$12 sps:$4 sm:$0xff]   ;;  %v1792_v12 = vld [vmem:[%s2285_s1 + $0x60] ss:$12 sps:$4 sm:$0xff]  }
   0x5   :  { %v1793_v13 = vld [vmem:[%s2285_s1 + $0x4c] ss:$12 sps:$4 sm:$0xff]   ;;  %v1795_v14 = vld [vmem:[%s2285_s1 + $0x50] ss:$12 sps:$4 sm:$0xff]   ;;  %v1796_v15 = vld [vmem:[%s2285_s1 + $0x48] ss:$12 sps:$4 sm:$0xff]  }
   0x6   :  { %381 = vmatpush1.bf16.msra.mxu1 %v1783_v5  ;;  %v1797_v16 = vld [vmem:[%s2285_s1 + $0x34] ss:$12 sps:$4 sm:$0xff]   ;;  %v1799_v17 = vld [vmem:[%s2285_s1 + $0x38] ss:$12 sps:$4 sm:$0xff]   ;;  %v1800_v18 = vld [vmem:[%s2285_s1 + $0x30] ss:$12 sps:$4 sm:$0xff]  }
   0x7   :  { %300 = vmatpush1.bf16.msra.mxu0 %v1784_v6  ;;  %382 = vmatprep.subr.bf16.mxu1 %v1865_v0  ;;  %v1801_v19 = vld [vmem:[%s2285_s1 + $0x1c] ss:$12 sps:$4 sm:$0xff]   ;;  %v1815_v20 = vld [vmem:[%s2286_s0 + $0x4] ss:$8 sps:$4 sm:$0xff]   ;;  %v1829_v33 = vld [vmem:[%s2287_s3 + $0x70] sm:$0xff]   ;;  %v81_v59 = vshrl.u32 %v80_v58, 7 }
   0x8   :  { %301 = vmatprep.subr.bf16.mxu0 %v1785_v7  ;;  %v1803_v21 = vld [vmem:[%s2285_s1 + $0x20] ss:$12 sps:$4 sm:$0xff]   ;;  %v1804_v22 = vld [vmem:[%s2285_s1 + $0x18] ss:$12 sps:$4 sm:$0xff]   ;;  %1494 = vmatprep.mubr.msk.bf16.mxu1 %vm281_vm0, %v1815_v20  ;;  %v1807_v24 = vld [vmem:[%s2285_s1 + $0x8] ss:$12 sps:$4 sm:$0xff]  }
   0x9   :  { %v1805_v23 = vld [vmem:[%s2285_s1 + $0x4] ss:$12 sps:$4 sm:$0xff]   ;;  %1489 = vmatprep.mubr.msk.bf16.mxu0 %vm281_vm0, %v1815_v20  ;;  %v1808_v25 = vld [vmem:[%s2285_s1] ss:$12 sps:$4 sm:$0xff]   ;;  %v1811_v27 = vld [vmem:[%s2285_s1 + $0xc8] ss:$12 sps:$4 sm:$0xff]  }
   0xa   :  { %383 = vmatpush1.bf16.msra.mxu1 %v1787_v8  ;;  %v1809_v26 = vld [vmem:[%s2285_s1 + $0xc4] ss:$12 sps:$4 sm:$0xff]   ;;  %v1812_v28 = vld [vmem:[%s2285_s1 + $0xc0] ss:$12 sps:$4 sm:$0xff]   ;;  %v1827_v30 = vld [vmem:[%s2287_s3 + $0x78] sm:$0xff]   ;;  %v90_v60 = vsub.s32 2, %v81_v59 }
   0xb   :  { %302 = vmatpush1.bf16.msra.mxu0 %v1788_v9  ;;  %384 = vmatprep.subr.bf16.mxu1 %v1865_v0  ;;  %v1813_v29 = vld [vmem:[%s2286_s0] ss:$8 sps:$4 sm:$0xff]   ;;  %v1816_v31 = vld [vmem:[%s2286_s0 + $0x14] ss:$8 sps:$4 sm:$0xff]   ;;  %v1818_v38 = vld [vmem:[%s2286_s0 + $0x10] ss:$8 sps:$4 sm:$0xff]  }
   0xc   :  { %303 = vmatprep.subr.bf16.mxu0 %v1789_v10  ;;  %v1828_v32 = vld [vmem:[%s2287_s3 + $0x38] sm:$0xff]   ;;  %v1831_v35 = vld [vmem:[%s2287_s3 + $0x88] sm:$0xff]   ;;  %v1830_v36 = vld [vmem:[%s2287_s3 + $0x30] sm:$0xff]   ;;  %v86_v63 = vsub.s32 1, %v81_v59  ;;  %vm643_vm2 = vcmask 261120  }
   0xd   :  { %v1832_v37 = vld [vmem:[%s2287_s3 + $0x68] sm:$0xff]   ;;  %v1834_v41 = vld [vmem:[%s2287_s3 + $0x60] sm:$0xff]   ;;  %v1836_v43 = vld [vmem:[%s2287_s3 + $0x58] sm:$0xff]  }
   0xe   :  { %385 = vmatpush1.bf16.msra.mxu1 %v1791_v11  ;;  %v1819_v39 = vld [vmem:[%s2286_s0 + $0x24] ss:$8 sps:$4 sm:$0xff]   ;;  %v1821_v44 = vld [vmem:[%s2286_s0 + $0x20] ss:$8 sps:$4 sm:$0xff]   ;;  %v1822_v45 = vld [vmem:[%s2286_s0 + $0x34] ss:$8 sps:$4 sm:$0xff]  }
   0xf   :  { %304 = vmatpush1.bf16.msra.mxu0 %v1792_v12  ;;  %386 = vmatprep.subr.bf16.mxu1 %v1865_v0  ;;  %v1833_v40 = vld [vmem:[%s2287_s3 + $0x28] sm:$0xff]   ;;  %v1835_v42 = vld [vmem:[%s2287_s3 + $0x20] sm:$0xff]   ;;  %v1837_v46 = vld [vmem:[%s2287_s3 + $0x18] sm:$0xff]  }
  0x10   :  { %305 = vmatprep.subr.bf16.mxu0 %v1793_v13  ;;  %v1838_v47 = vld [vmem:[%s2287_s3 + $0x50] sm:$0xff]   ;;  %v41_v48 = vld [vmem:[%s2286_s0 + $0x40] sm:$0xff]  ;;  %v1841_v54 = vld [vmem:[%s2287_s3 + $0x48] sm:$0xff]  }
  0x11   :  { %v1824_v49 = vld [vmem:[%s2286_s0 + $0x30] ss:$8 sps:$4 sm:$0xff]   ;;  %v1461_v50 = vcombine.high %v41_v48, %v41_v48  ;;  %v1460_v51 = vcombine.low %v41_v48, %v41_v48  ;;  %v1840_v53 = vld [vmem:[%s2287_s3 + $0x80] sm:$0xff]   ;;  %v1842_v55 = vld [vmem:[%s2287_s3 + $0x8] sm:$0xff]  }
  0x12   :  { %387 = vmatpush1.bf16.msra.mxu1 %v1795_v14  ;;  %v1839_v52 = vld [vmem:[%s2287_s3 + $0x10] sm:$0xff]   ;;  %v1843_v56 = vld [vmem:[%s2287_s3 + $0x40] sm:$0xff]   ;;  %v1846_v20 = vld [vmem:[%s2288_s5 + $0x8] sm:$0xff]  }
  0x13   :  { %306 = vmatpush1.bf16.msra.mxu0 %v1796_v15  ;;  %388 = vmatprep.subr.bf16.mxu1 %v1865_v0  ;;  %v1844_v57 = vld [vmem:[%s2287_s3] sm:$0xff]  }
  0x14   :  { %307 = vmatprep.subr.bf16.mxu0 %v1797_v16  ;;  %v78_v61 = vld [vmem:[%s2289_s2] sm:$0x7] }
  0x15   :  { %v2108_v62 = vrot.slane %v78_v61, %v90_v60  ;;  %v2111_v5 = vrot.slane %v78_v61, %v86_v63 }
  0x16   :  { %389 = vmatpush1.bf16.msra.mxu1 %v1799_v17 }
  0x17   :  { %308 = vmatpush1.bf16.msra.mxu0 %v1800_v18  ;;  %390 = vmatprep.subr.bf16.mxu1 %v1865_v0 }
  0x18   :  { %309 = vmatprep.subr.bf16.mxu0 %v1801_v19 }
  0x1a   :  { %391 = vmatpush1.bf16.msra.mxu1 %v1803_v21 }
  0x1b   :  { %310 = vmatpush1.bf16.msra.mxu0 %v1804_v22  ;;  %392 = vmatprep.subr.bf16.mxu1 %v1865_v0 }
  0x1c   :  { %311 = vmatprep.subr.bf16.mxu0 %v1805_v23 }
  0x1e   :  { %393 = vmatpush1.bf16.msra.mxu1 %v1807_v24 }
  0x1f   :  { %312 = vmatpush1.bf16.msra.mxu0 %v1808_v25  ;;  %408 = vmatprep.subr.bf16.mxu1 %v1865_v0  ;;  %v82_v0 = vsub.s32 0, %v81_v59 }
  0x20   :  { %327 = vmatprep.subr.bf16.mxu0 %v1809_v26 }
  0x21   :  { %v2113_v6 = vrot.slane %v78_v61, %v82_v0 }
  0x22   :  { %409 = vmatpush2.bf16.msra.mxu1 %v1811_v27 }
  0x23   :  { %328 = vmatpush2.bf16.msra.mxu0 %v1812_v28  ;;  %1670 = vmatprep.subr.bf16.mxu1 %v1866_v34 }
  0x24   :  { %1587 = vmatprep.subr.bf16.mxu0 %v1827_v30 }
  0x25   :  { %411 = vmatmul.mubr.bf16.vlgmr.msra.gmra.mxu1 %v1813_v29 }
  0x26   :  { %330 = vmatmul.mubr.bf16.vlgmr.msra.gmra.mxu0 %v1813_v29  ;;  %1495 = vmatprep.mubr.msk.bf16.mxu1 %vm281_vm0, %v1816_v31 }
  0x27   :  { %1490 = vmatprep.mubr.msk.bf16.mxu0 %vm281_vm0, %v1816_v31  ;;  %1588 = vmatpush3.bf16.msra.mxu0 %v1828_v32  ;;  %v1845_v32 = vld [vmem:[%s2288_s5 + $0x18] sm:$0xff]  }
  0x28   :  { %1589 = vmatprep.subr.bf16.mxu0 %v1829_v33  ;;  %1671 = vmatpush3.bf16.msra.mxu1 %v1831_v35 }
  0x29   :  { %1672 = vmatprep.subr.bf16.mxu1 %v1866_v34 }
  0x2b   :  { %1590 = vmatpush3.bf16.msra.mxu0 %v1830_v36 }
  0x2c   :  { %1591 = vmatprep.subr.bf16.mxu0 %v1832_v37  ;;  %1673 = vmatpush3.bf16.msra.mxu1 %v1840_v53 }
  0x2d   :  { %419 = vmatmul.mubr.bf16.gmra.mxu1 %v1818_v38  ;;  %1702 = vmatprep.subr.bf16.mxu1 %v1866_v34 }
  0x2e   :  { %340 = vmatmul.mubr.bf16.gmra.mxu0 %v1818_v38  ;;  %1496 = vmatprep.mubr.msk.bf16.mxu1 %vm281_vm0, %v1819_v39 }
  0x2f   :  { %1491 = vmatprep.mubr.msk.bf16.mxu0 %vm281_vm0, %v1819_v39  ;;  %1592 = vmatpush3.bf16.msra.mxu0 %v1833_v40 }
  0x30   :  { %1593 = vmatprep.subr.bf16.mxu0 %v1834_v41 }
  0x33   :  { %1594 = vmatpush3.bf16.msra.mxu0 %v1835_v42 }
  0x34   :  { %1595 = vmatprep.subr.bf16.mxu0 %v1836_v43 }
  0x35   :  { %427 = vmatmul.mubr.bf16.gmra.mxu1 %v1821_v44 }
  0x36   :  { %350 = vmatmul.mubr.bf16.gmra.mxu0 %v1821_v44  ;;  %1497 = vmatprep.mubr.msk.bf16.mxu1 %vm281_vm0, %v1822_v45 }
  0x37   :  { %1492 = vmatprep.mubr.msk.bf16.mxu0 %vm281_vm0, %v1822_v45  ;;  %1596 = vmatpush3.bf16.msra.mxu0 %v1837_v46 }
  0x38   :  { %1597 = vmatprep.subr.bf16.mxu0 %v1838_v47 }
  0x3b   :  { %1598 = vmatpush3.bf16.msra.mxu0 %v1839_v52 }
  0x3c   :  { %1599 = vmatprep.subr.bf16.mxu0 %v1841_v54 }
  0x3d   :  { %435 = vmatmul.mubr.bf16.gmra.mxu1 %v1824_v49 }
  0x3e   :  { %360 = vmatmul.mubr.bf16.gmra.mxu0 %v1824_v49  ;;  %1498 = vmatprep.mubr.msk.bf16.mxu1 %vm281_vm0, %v1461_v50 }
  0x3f   :  { %1493 = vmatprep.mubr.msk.bf16.mxu0 %vm281_vm0, %v1461_v50  ;;  %1600 = vmatpush3.bf16.msra.mxu0 %v1842_v55 }
  0x40   :  { %1601 = vmatprep.subr.bf16.mxu0 %v1843_v56 }
  0x43   :  { %1602 = vmatpush3.bf16.msra.mxu0 %v1844_v57 }
  0x44   :  { %1694 = vmatprep.subr.bf16.mxu0 %v1866_v34 }
  0x45   :  { %443 = vmatmul.mubr.bf16.gmra.mxu1 %v1460_v51 }
  0x46   :  { %370 = vmatmul.mubr.bf16.gmra.mxu0 %v1460_v51  ;;  %1674 = vmatprep.mubr.msk.bf16.mxu1 %vm1867_vm1, %v1866_v34 }
  0xe5   :  { %v412_v1 = vpop.f32.mrf.mxu1 }
  0xe6   :  { %v413_v2 = vadd.f32 %v412_v1, %v2108_v62  ;;  %v331_v3 = vpop.f32.mrf.mxu0 }
  0xe7   :  { %v414_v4 = vpop.f32.mrf.mxu1  ;;  %v332_v15 = vadd.f32 %v331_v3, %v2113_v6 }
  0xe8   :  { %v333_v7 = vpop.f32.mrf.mxu0  ;;  %v452_v9 = vmax.f32 %v413_v2, 0.0 }
  0xe9   :  { %v415_v8 = vpop.f32.mrf.mxu1  ;;  %v334_v12 = vadd.f32 %v333_v7, %v2111_v5  ;;  %v450_v28 = vmax.f32 %v332_v15, 0.0 }
  0xea   :  { %v416_v10 = vadd.f32 %v415_v8, %v2108_v62  ;;  %v335_v11 = vpop.f32.mrf.mxu0 }
  0xeb   :  { %v336_v13 = vadd.f32 %v335_v11, %v2113_v6  ;;  %v417_v14 = vpop.f32.mrf.mxu1  ;;  %v451_v25 = vmax.f32 %v334_v12, 0.0 }
  0xec   :  { %v455_v16 = vmax.f32 %v416_v10, 0.0  ;;  %v337_v17 = vpop.f32.mrf.mxu0 }
  0xed   :  { %v338_v18 = vadd.f32 %v337_v17, %v2111_v5  ;;  %v420_v19 = vpop.f32.mrf.mxu1  ;;  %v453_v22 = vmax.f32 %v336_v13, 0.0 }
  0xee   :  { %v479_v21 = vpack.c.bf16 %v455_v16, %v452_v9  ;;  %v341_v23 = vpop.f32.mrf.mxu0  ;;  %v421_v24 = vadd.f32 %v420_v19, %v2108_v62 }
  0xef   :  { %v454_v26 = vmax.f32 %v338_v18, 0.0  ;;  %v422_v27 = vpop.f32.mrf.mxu1  ;;  %v477_v33 = vpack.c.bf16 %v453_v22, %v450_v28  ;;  %v342_v41 = vadd.f32 %v341_v23, %v2113_v6 }
  0xf0   :  { %v343_v29 = vpop.f32.mrf.mxu0  ;;  %1675 = vmatmul.mubr.msk.bf16.vlgmr.msra.gmra.mxu1 %vm643_vm2, %v479_v21  ;;  %v458_v35 = vmax.f32 %v421_v24, 0.0 }
  0xf1   :  { %v478_v30 = vpack.c.bf16 %v454_v26, %v451_v25  ;;  %v423_v31 = vpop.f32.mrf.mxu1  ;;  %1678 = vmatprep.mubr.msk.bf16.mxu1 %vm1867_vm1, %v1866_v34  ;;  %1703 = vmatpush3.bf16.msra.mxu1 %v1846_v20  ;;  %v344_v38 = vadd.f32 %v343_v29, %v2111_v5  ;;  %v456_v53 = vmax.f32 %v342_v41, 0.0 }
  0xf2   :  { %v345_v36 = vpop.f32.mrf.mxu0  ;;  %v424_v37 = vadd.f32 %v423_v31, %v2108_v62  ;;  %1704 = vmatprep.subr.bf16.mxu1 %v1866_v34 }
  0xf3   :  { %v346_v39 = vadd.f32 %v345_v36, %v2113_v6  ;;  %691 = vmatprep.mubr.bf16.mxu0 %v478_v30  ;;  %v425_v40 = vpop.f32.mrf.mxu1  ;;  %v457_v50 = vmax.f32 %v344_v38, 0.0 }
  0xf4   :  { %v461_v42 = vmax.f32 %v424_v37, 0.0  ;;  %v347_v43 = vpop.f32.mrf.mxu0  ;;  %692 = vmatmul.mubr.bf16.vlgmr.msra.gmra.mxu0 %v477_v33 }
  0xf5   :  { %v348_v44 = vadd.f32 %v347_v43, %v2111_v5  ;;  %v428_v45 = vpop.f32.mrf.mxu1  ;;  %1695 = vmatpush3.bf16.msra.mxu0 %v1845_v32  ;;  %v459_v46 = vmax.f32 %v346_v39, 0.0 }
  0xf6   :  { %v482_v47 = vpack.c.bf16 %v461_v42, %v458_v35  ;;  %v351_v48 = vpop.f32.mrf.mxu0  ;;  %v429_v49 = vadd.f32 %v428_v45, %v2108_v62  ;;  %1696 = vmatprep.subr.bf16.mxu0 %v1866_v34 }
  0xf7   :  { %v460_v51 = vmax.f32 %v348_v44, 0.0  ;;  %v430_v52 = vpop.f32.mrf.mxu1  ;;  %v480_v57 = vpack.c.bf16 %v459_v46, %v456_v53  ;;  %v352_v1 = vadd.f32 %v351_v48, %v2113_v6  ;;  %v1848_v53 = vld [vmem:[%s2288_s5] sm:$0xff]  }
  0xf8   :  { %v353_v54 = vpop.f32.mrf.mxu0  ;;  %1679 = vmatmul.mubr.msk.bf16.gmra.mxu1 %vm643_vm2, %v482_v47  ;;  %v464_v58 = vmax.f32 %v429_v49, 0.0 }
  0xf9   :  { %v481_v55 = vpack.c.bf16 %v460_v51, %v457_v50  ;;  %v431_v56 = vpop.f32.mrf.mxu1  ;;  %1682 = vmatprep.mubr.msk.bf16.mxu1 %vm1867_vm1, %v1866_v34  ;;  %v354_v61 = vadd.f32 %v353_v54, %v2111_v5  ;;  %v462_v15 = vmax.f32 %v352_v1, 0.0  ;;  %1705 = vmatpush3.bf16.msra.mxu1 %v1848_v53 }
  0xfa   :  { %v355_v59 = vpop.f32.mrf.mxu0  ;;  %v432_v60 = vadd.f32 %v431_v56, %v2108_v62  ;;  %1718 = vmatprep.subr.bf16.mxu1 %v1866_v34 }
  0xfb   :  { %v356_v63 = vadd.f32 %v355_v59, %v2113_v6  ;;  %699 = vmatprep.mubr.bf16.mxu0 %v481_v55  ;;  %v433_v0 = vpop.f32.mrf.mxu1  ;;  %v463_v12 = vmax.f32 %v354_v61, 0.0 }
  0xfc   :  { %v467_v2 = vmax.f32 %v432_v60, 0.0  ;;  %v357_v3 = vpop.f32.mrf.mxu0  ;;  %700 = vmatmul.mubr.bf16.gmra.mxu0 %v480_v57 }
  0xfd   :  { %v358_v4 = vadd.f32 %v357_v3, %v2111_v5  ;;  %v436_v7 = vpop.f32.mrf.mxu1  ;;  %v465_v8 = vmax.f32 %v356_v63, 0.0 }
  0xfe   :  { %v485_v9 = vpack.c.bf16 %v467_v2, %v464_v58  ;;  %v361_v10 = vpop.f32.mrf.mxu0  ;;  %v437_v11 = vadd.f32 %v436_v7, %v2108_v62  ;;  %v2177_v58 = vld [vmem:[%s2290_s4] ss:$0 sm:$0xff] }
  0xff   :  { %v466_v13 = vmax.f32 %v358_v4, 0.0  ;;  %v438_v14 = vpop.f32.mrf.mxu1  ;;  %v483_v19 = vpack.c.bf16 %v465_v8, %v462_v15  ;;  %v362_v26 = vadd.f32 %v361_v10, %v2113_v6 }
 0x100   :  { %v363_v16 = vpop.f32.mrf.mxu0  ;;  %1683 = vmatmul.mubr.msk.bf16.gmra.mxu1 %vm643_vm2, %v485_v9  ;;  %v470_v20 = vmax.f32 %v437_v11, 0.0 }
 0x101   :  { %v484_v17 = vpack.c.bf16 %v466_v13, %v463_v12  ;;  %v439_v18 = vpop.f32.mrf.mxu1  ;;  %1686 = vmatprep.mubr.msk.bf16.mxu1 %vm1867_vm1, %v1866_v34  ;;  %v364_v23 = vadd.f32 %v363_v16, %v2111_v5  ;;  %v468_v39 = vmax.f32 %v362_v26, 0.0 }
 0x102   :  { %v365_v21 = vpop.f32.mrf.mxu0  ;;  %v440_v22 = vadd.f32 %v439_v18, %v2108_v62 }
 0x103   :  { %v366_v24 = vadd.f32 %v365_v21, %v2113_v6  ;;  %707 = vmatprep.mubr.bf16.mxu0 %v484_v17  ;;  %v441_v25 = vpop.f32.mrf.mxu1  ;;  %v469_v36 = vmax.f32 %v364_v23, 0.0 }
 0x104   :  { %v473_v27 = vmax.f32 %v440_v22, 0.0  ;;  %v367_v28 = vpop.f32.mrf.mxu0  ;;  %708 = vmatmul.mubr.bf16.gmra.mxu0 %v483_v19  ;;  %v1850_v22 = vld [vmem:[%s2288_s5 + $0x38] sm:$0xff]  }
 0x105   :  { %v368_v29 = vadd.f32 %v367_v28, %v2111_v5  ;;  %v444_v30 = vpop.f32.mrf.mxu1  ;;  %v471_v31 = vmax.f32 %v366_v24, 0.0 }
 0x106   :  { %v488_v32 = vpack.c.bf16 %v473_v27, %v470_v20  ;;  %v371_v33 = vpop.f32.mrf.mxu0  ;;  %v445_v35 = vadd.f32 %v444_v30, %v2108_v62  ;;  %v1849_v27 = vld [vmem:[%s2288_s5 + $0x28] sm:$0xff]  }
 0x107   :  { %v472_v37 = vmax.f32 %v368_v29, 0.0  ;;  %v446_v38 = vpop.f32.mrf.mxu1  ;;  %v372_v40 = vadd.f32 %v371_v33, %v2113_v6  ;;  %v486_v46 = vpack.c.bf16 %v471_v31, %v468_v39  ;;  %v1852_v33 = vld [vmem:[%s2288_s5 + $0x30] sm:$0xff]   ;;  %v1851_v39 = vld [vmem:[%s2288_s5 + $0x20] sm:$0xff]  }
 0x108   :  { %1687 = vmatmul.mubr.msk.bf16.gmra.mxu1 %vm643_vm2, %v488_v32  ;;  %v373_v41 = vpop.f32.mrf.mxu0  ;;  %v476_v42 = vmax.f32 %v445_v35, 0.0 }
 0x109   :  { %v487_v43 = vpack.c.bf16 %v472_v37, %v469_v36  ;;  %v374_v44 = vadd.f32 %v373_v41, %v2111_v5  ;;  %v447_v45 = vpop.f32.mrf.mxu1  ;;  %1690 = vmatprep.mubr.msk.bf16.mxu1 %vm1867_vm1, %v1866_v34  ;;  %v474_v49 = vmax.f32 %v372_v40, 0.0  ;;  %v1847_v5 = vld [vmem:[%s2288_s5 + $0x10] sm:$0xff]  }
 0x10a   :  { %v375_v47 = vpop.f32.mrf.mxu0  ;;  %v491_v6 = vpack.c.bf16 %v476_v42, %v476_v42  ;;  %1697 = vmatpush3.bf16.msra.mxu0 %v1847_v5 }
 0x10b   :  { %715 = vmatprep.mubr.bf16.mxu0 %v487_v43  ;;  %v475_v62 = vmax.f32 %v374_v44, 0.0  ;;  %v448_v48 = vpop.f32.mrf.mxu1  ;;  %v489_v52 = vpack.c.bf16 %v474_v49, %v474_v49  ;;  %1710 = vmatprep.subr.bf16.mxu0 %v1866_v34  ;;  %v1854_v49 = vld [vmem:[%s2288_s5 + $0x58] sm:$0xff]  }
 0x10c   :  { %716 = vmatmul.mubr.bf16.gmra.mxu0 %v486_v46  ;;  %v376_v50 = vpop.f32.mrf.mxu0  ;;  %v1853_v48 = vld [vmem:[%s2288_s5 + $0x48] sm:$0xff]  }
 0x10d   :  { %v490_v51 = vpack.c.bf16 %v475_v62, %v475_v62 }
 0x10f   :  { %723 = vmatprep.mubr.bf16.mxu0 %v490_v51 }
 0x110   :  { %1691 = vmatmul.mubr.msk.bf16.gmra.mxu1 %vm643_vm2, %v491_v6 }
 0x111   :  { %1706 = vmatprep.mubr.msk.bf16.mxu1 %vm1867_vm1, %v1866_v34 }
 0x114   :  { %724 = vmatmul.mubr.bf16.gmra.mxu0 %v489_v52 }
 0x115   :  { %1698 = vmatprep.mubr.msk.bf16.mxu0 %vm1867_vm1, %v1866_v34 }
 0x1b0   :  { %v765_v54 = vpop.f32.mrf.mxu1 }
 0x1b2   :  { %v1676_v55 = vpop.f32.mrf.mxu1 }
 0x1b4   :  { %v1603_v56 = vpop.f32.mrf.mxu0  ;;  %v768_v57 = vpop.f32.mrf.mxu1 }
 0x1b6   :  { %v1604_v59 = vpop.f32.mrf.mxu0  ;;  %v1677_v60 = vpop.f32.mrf.mxu1 }
 0x1b7   :  { %v1605_v61 = vadd.f32 %v1604_v59, %v1603_v56  ;;  %v1855_v56 = vld [vmem:[%s2288_s5 + $0x40] sm:$0xff]  }
 0x1b8   :  { %v1606_v63 = vpop.f32.mrf.mxu0  ;;  %v773_v0 = vpop.f32.mrf.mxu1 }
 0x1b9   :  { %v694_v1 = vadd.f32 %v1605_v61, %v2177_v58 }
 0x1ba   :  { %v1607_v2 = vpop.f32.mrf.mxu0  ;;  %v1680_v3 = vpop.f32.mrf.mxu1 }
 0x1bb   :  { %v1608_v4 = vadd.f32 %v1607_v2, %v1606_v63  ;;  %v766_v9 = vadd.f32 %v765_v54, %v694_v1 }
 0x1bc   :  { %v1609_v7 = vpop.f32.mrf.mxu0  ;;  %v776_v8 = vpop.f32.mrf.mxu1 }
 0x1bd   :  { %v697_v10 = vadd.f32 %v1608_v4, %v2177_v58  ;;  %v803_v17 = vmax.f32 %v766_v9, 0.0 }
 0x1be   :  { %v1610_v11 = vpop.f32.mrf.mxu0  ;;  %v1681_v12 = vpop.f32.mrf.mxu1 }
 0x1bf   :  { %v769_v13 = vadd.f32 %v768_v57, %v697_v10  ;;  %v1611_v14 = vadd.f32 %v1610_v11, %v1609_v7  ;;  %v1856_v57 = vld [vmem:[%s2288_s5 + $0x50] sm:$0xff]   ;;  %v1857_v7 = vld [vmem:[%s2288_s5 + $0x68] sm:$0xff]  }
 0x1c0   :  { %v1612_v15 = vpop.f32.mrf.mxu0  ;;  %v781_v16 = vpop.f32.mrf.mxu1 }
 0x1c1   :  { %v804_v18 = vmax.f32 %v769_v13, 0.0  ;;  %v702_v19 = vadd.f32 %v1611_v14, %v2177_v58 }
 0x1c2   :  { %v1613_v20 = vpop.f32.mrf.mxu0  ;;  %v1684_v21 = vpop.f32.mrf.mxu1 }
 0x1c3   :  { %v812_v23 = vpack.c.bf16 %v804_v18, %v803_v17  ;;  %v1614_v24 = vadd.f32 %v1613_v20, %v1612_v15  ;;  %v774_v29 = vadd.f32 %v773_v0, %v702_v19  ;;  %v1859_v18 = vld [vmem:[%s2288_s5 + $0x60] sm:$0xff]   ;;  %v1860_v19 = vld [vmem:[%s2288_s5 + $0x70] sm:$0xff]  }
 0x1c4   :  { %v1615_v25 = vpop.f32.mrf.mxu0  ;;  %v784_v26 = vpop.f32.mrf.mxu1 }
 0x1c5   :  { %v827_v28 = vrot.slane %v812_v23, 4  ;;  %v705_v30 = vadd.f32 %v1614_v24, %v2177_v58  ;;  %1707 = vmatmul.mubr.msk.bf16.vlgmr.msra.gmra.mxu1 %vm643_vm2, %v812_v23  ;;  %v805_v40 = vmax.f32 %v774_v29, 0.0 }
 0x1c6   :  { %v1616_v31 = vpop.f32.mrf.mxu0  ;;  %v1685_v32 = vpop.f32.mrf.mxu1  ;;  %1719 = vmatpush3.bf16.msra.mxu1 %v1850_v22  ;;  %1722 = vmatprep.mubr.msk.bf16.mxu1 %vm1867_vm1, %v1866_v34 }
 0x1c7   :  { %v777_v35 = vadd.f32 %v776_v8, %v705_v30  ;;  %v1617_v36 = vadd.f32 %v1616_v31, %v1615_v25  ;;  %1699 = vmatmul.mubr.msk.bf16.vlgmr.msra.gmra.mxu0 %vm643_vm2, %v827_v28  ;;  %1720 = vmatprep.subr.bf16.mxu1 %v1866_v34  ;;  %v1858_v8 = vld [vmem:[%s2288_s5 + $0x78] sm:$0xff]   ;;  %v1861_v25 = vld [vmem:[%s2288_s5 + $0x88] sm:$0xff]   ;;  %v1864_v31 = vld [vmem:[%s2291_s7] sm:$0xff]  }
 0x1c8   :  { %1711 = vmatpush3.bf16.msra.mxu0 %v1849_v27  ;;  %v1618_v37 = vpop.f32.mrf.mxu0  ;;  %v789_v38 = vpop.f32.mrf.mxu1  ;;  %1714 = vmatprep.mubr.msk.bf16.mxu0 %vm1867_vm1, %v1866_v34  ;;  %v1862_v27 = vld [vmem:[%s2288_s5 + $0x80] sm:$0xff]   ;;  %v1863_v30 = vld [vmem:[%s2291_s7 + $0x8] sm:$0xff]  }
 0x1c9   :  { %v806_v41 = vmax.f32 %v777_v35, 0.0  ;;  %v710_v42 = vadd.f32 %v1617_v36, %v2177_v58  ;;  %1712 = vmatprep.subr.bf16.mxu0 %v1866_v34 }
 0x1ca   :  { %v1619_v43 = vpop.f32.mrf.mxu0  ;;  %v1688_v44 = vpop.f32.mrf.mxu1  ;;  %1721 = vmatpush3.bf16.msra.mxu1 %v1852_v33 }
 0x1cb   :  { %v813_v45 = vpack.c.bf16 %v806_v41, %v805_v40  ;;  %v1620_v46 = vadd.f32 %v1619_v43, %v1618_v37  ;;  %1734 = vmatprep.subr.bf16.mxu1 %v1866_v34  ;;  %v782_v6 = vadd.f32 %v781_v16, %v710_v42 }
 0x1cc   :  { %1713 = vmatpush3.bf16.msra.mxu0 %v1851_v39  ;;  %v1621_v47 = vpop.f32.mrf.mxu0  ;;  %v792_v62 = vpop.f32.mrf.mxu1 }
 0x1cd   :  { %v1005_v50 = vrot.slane %v813_v45, 4  ;;  %v713_v51 = vadd.f32 %v1620_v46, %v2177_v58  ;;  %1726 = vmatprep.subr.bf16.mxu0 %v1866_v34  ;;  %v807_v60 = vmax.f32 %v782_v6, 0.0 }
 0x1ce   :  { %v1622_v52 = vpop.f32.mrf.mxu0  ;;  %v1689_v5 = vpop.f32.mrf.mxu1 }
 0x1cf   :  { %v785_v53 = vadd.f32 %v784_v26, %v713_v51  ;;  %v1623_v54 = vadd.f32 %v1622_v52, %v1621_v47  ;;  %1715 = vmatmul.mubr.msk.bf16.vlgmr.msra.gmra.mxu0 %vm643_vm2, %v813_v45  ;;  %1723 = vmatmul.mubr.msk.bf16.vlgmr.msra.gmra.mxu1 %vm643_vm2, %v1005_v50 }
 0x1d0   :  { %1727 = vmatpush3.bf16.msra.mxu0 %v1853_v48  ;;  %v1624_v55 = vpop.f32.mrf.mxu0  ;;  %1735 = vmatpush3.bf16.msra.mxu1 %v1854_v49  ;;  %v797_v59 = vpop.f32.mrf.mxu1 }
 0x1d1   :  { %v808_v61 = vmax.f32 %v785_v53, 0.0  ;;  %v718_v63 = vadd.f32 %v1623_v54, %v2177_v58  ;;  %1728 = vmatprep.subr.bf16.mxu0 %v1866_v34  ;;  %1736 = vmatprep.subr.bf16.mxu1 %v1866_v34 }
 0x1d2   :  { %v1625_v0 = vpop.f32.mrf.mxu0  ;;  %1730 = vmatprep.mubr.msk.bf16.mxu0 %vm1867_vm1, %v1866_v34  ;;  %1738 = vmatprep.mubr.msk.bf16.mxu1 %vm1867_vm1, %v1866_v34  ;;  %v1692_v1 = vpop.f32.mrf.mxu1 }
 0x1d3   :  { %v814_v2 = vpack.c.bf16 %v808_v61, %v807_v60  ;;  %v1626_v3 = vadd.f32 %v1625_v0, %v1624_v55  ;;  %v790_v11 = vadd.f32 %v789_v38, %v718_v63 }
 0x1d4   :  { %1729 = vmatpush3.bf16.msra.mxu0 %v1855_v56  ;;  %v1627_v4 = vpop.f32.mrf.mxu0  ;;  %1737 = vmatpush3.bf16.msra.mxu1 %v1856_v57  ;;  %v800_v9 = vpop.f32.mrf.mxu1 }
 0x1d5   :  { %v1129_v10 = vrot.slane %v814_v2, 4  ;;  %v721_v12 = vadd.f32 %v1626_v3, %v2177_v58  ;;  %1742 = vmatprep.subr.bf16.mxu0 %v1866_v34  ;;  %1750 = vmatprep.subr.bf16.mxu1 %v1866_v34  ;;  %v809_v20 = vmax.f32 %v790_v11, 0.0  ;;  %v1582_v9 = vld [vmem:[%s2292_s6] ss:$0 sm:$0xff] }
 0x1d6   :  { %v1628_v13 = vpop.f32.mrf.mxu0  ;;  %v1693_v14 = vpop.f32.mrf.mxu1 }
 0x1d7   :  { %v793_v15 = vadd.f32 %v792_v62, %v721_v12  ;;  %v1629_v16 = vadd.f32 %v1628_v13, %v1627_v4  ;;  %1731 = vmatmul.mubr.msk.bf16.vlgmr.msra.gmra.mxu0 %vm643_vm2, %v814_v2  ;;  %1739 = vmatmul.mubr.msk.bf16.vlgmr.msra.gmra.mxu1 %vm643_vm2, %v1129_v10 }
 0x1d8   :  { %1743 = vmatpush3.bf16.msra.mxu0 %v1857_v7  ;;  %v1630_v17 = vpop.f32.mrf.mxu0  ;;  %1751 = vmatpush3.bf16.msra.mxu1 %v1858_v8 }
 0x1d9   :  { %v810_v21 = vmax.f32 %v793_v15, 0.0  ;;  %v726_v22 = vadd.f32 %v1629_v16, %v2177_v58  ;;  %1744 = vmatprep.subr.bf16.mxu0 %v1866_v34  ;;  %1752 = vmatprep.subr.bf16.mxu1 %v1866_v34  ;;  %v1583_v17 = vld [vmem:[%s2293_s8] ss:$0 sm:$0xff] }
 0x1da   :  { %v1631_v23 = vpop.f32.mrf.mxu0  ;;  %1746 = vmatprep.mubr.msk.bf16.mxu0 %vm1867_vm1, %v1866_v34  ;;  %1754 = vmatprep.mubr.msk.bf16.mxu1 %vm1867_vm1, %v1866_v34 }
 0x1db   :  { %v815_v24 = vpack.c.bf16 %v810_v21, %v809_v20  ;;  %v798_v58 = vadd.f32 %v797_v59, %v726_v22 }
 0x1dc   :  { %1745 = vmatpush3.bf16.msra.mxu0 %v1859_v18  ;;  %1753 = vmatpush3.bf16.msra.mxu1 %v1860_v19 }
 0x1dd   :  { %v1253_v26 = vrot.slane %v815_v24, 4  ;;  %1758 = vmatprep.subr.bf16.mxu0 %v1866_v34  ;;  %1766 = vmatprep.subr.bf16.mxu1 %v1866_v34  ;;  %v811_v28 = vmax.f32 %v798_v58, 0.0 }
 0x1df   :  { %1747 = vmatmul.mubr.msk.bf16.vlgmr.msra.gmra.mxu0 %vm643_vm2, %v815_v24  ;;  %1755 = vmatmul.mubr.msk.bf16.vlgmr.msra.gmra.mxu1 %vm643_vm2, %v1253_v26  ;;  %v816_v29 = vpack.c.bf16 %v811_v28, %v811_v28 }
 0x1e0   :  { %1759 = vmatpush3.bf16.msra.mxu0 %v1861_v25  ;;  %1762 = vmatprep.mubr.msk.bf16.mxu0 %vm1867_vm1, %v1866_v34 }
 0x1e1   :  { %1760 = vmatprep.subr.bf16.mxu0 %v1866_v34  ;;  %1770 = vmatprep.mubr.msk.bf16.mxu1 %vm1867_vm1, %v1866_v34 }
 0x1e2   :  { %1767 = vmatpush3.bf16.msra.mxu1 %v1863_v30 }
 0x1e3   :  { %1768 = vmatprep.subr.bf16.mxu1 %v1866_v34 }
 0x1e4   :  { %1761 = vmatpush3.bf16.msra.mxu0 %v1862_v27 }
 0x1e6   :  { %1769 = vmatpush3.bf16.msra.mxu1 %v1864_v31 }
 0x1e7   :  { %1763 = vmatmul.mubr.msk.bf16.vlgmr.msra.gmra.mxu0 %vm643_vm2, %v816_v29 }
 0x285   :  { %v932_v32 = vpop.f32.mrf.mxu1 }
 0x287   :  { %v877_v33 = vpop.f32.mrf.mxu0  ;;  %v1708_v35 = vpop.f32.mrf.mxu1 }
 0x288   :  { %v933_v34 = vadd.f32 %v932_v32, %v877_v33 }
 0x289   :  { %v1700_v36 = vpop.f32.mrf.mxu0  ;;  %v935_v37 = vpop.f32.mrf.mxu1 }
 0x28b   :  { %v880_v38 = vpop.f32.mrf.mxu0  ;;  %v1709_v39 = vpop.f32.mrf.mxu1 }
 0x28d   :  { %v1701_v40 = vpop.f32.mrf.mxu0 }
 0x28f   :  { %v992_v41 = vpop.f32.mrf.mxu0  ;;  %v1055_v42 = vpop.f32.mrf.mxu1 }
 0x290   :  { %v998_v48 = vadd.f32 %v992_v41, %v933_v34 }
 0x291   :  { %v1716_v43 = vpop.f32.mrf.mxu0  ;;  %v1724_v44 = vpop.f32.mrf.mxu1 }
 0x292   :  { %v1061_v52 = vadd.f32 %v1055_v42, %v998_v48 }
 0x293   :  { %v995_v45 = vpop.f32.mrf.mxu0  ;;  %v1058_v46 = vpop.f32.mrf.mxu1 }
 0x295   :  { %v1717_v47 = vpop.f32.mrf.mxu0  ;;  %v1725_v62 = vpop.f32.mrf.mxu1 }
 0x297   :  { %v1116_v49 = vpop.f32.mrf.mxu0  ;;  %v1179_v50 = vpop.f32.mrf.mxu1 }
 0x298   :  { %v1122_v54 = vadd.f32 %v1116_v49, %v1061_v52 }
 0x299   :  { %v1732_v6 = vpop.f32.mrf.mxu0  ;;  %v1740_v51 = vpop.f32.mrf.mxu1 }
 0x29a   :  { %v1185_v60 = vadd.f32 %v1179_v50, %v1122_v54 }
 0x29b   :  { %v1119_v5 = vpop.f32.mrf.mxu0  ;;  %v1182_v53 = vpop.f32.mrf.mxu1 }
 0x29d   :  { %v1733_v55 = vpop.f32.mrf.mxu0  ;;  %v1741_v56 = vpop.f32.mrf.mxu1 }
 0x29f   :  { %v1240_v57 = vpop.f32.mrf.mxu0  ;;  %v1303_v59 = vpop.f32.mrf.mxu1 }
 0x2a0   :  { %v1246_v0 = vadd.f32 %v1240_v57, %v1185_v60 }
 0x2a1   :  { %v1748_v61 = vpop.f32.mrf.mxu0  ;;  %v1756_v63 = vpop.f32.mrf.mxu1 }
 0x2a2   :  { %v1309_v7 = vadd.f32 %v1303_v59, %v1246_v0 }
 0x2a3   :  { %v1243_v1 = vpop.f32.mrf.mxu0  ;;  %v1306_v2 = vpop.f32.mrf.mxu1 }
 0x2a5   :  { %v1749_v3 = vpop.f32.mrf.mxu0  ;;  %v1757_v4 = vpop.f32.mrf.mxu1 }
 0x2a7   :  { %v1364_v8 = vpop.f32.mrf.mxu0 }
 0x2a8   :  { %v1370_v10 = vadd.f32 %v1364_v8, %v1309_v7 }
 0x2a9   :  { %v1764_v11 = vpop.f32.mrf.mxu0 }
 0x2aa   :  { %v1378_v12 = vadd.f32 %v1582_v9, %v1370_v10 }
 0x2ab   :  { %v1367_v13 = vpop.f32.mrf.mxu0 }
 0x2ac   :  { %v1379_v14 = vmax.f32 %v1378_v12, 0.0 }
 0x2ad   :  { %v1765_v15 = vpop.f32.mrf.mxu0 }
 0x2ae   :  { %v1380_v16 = vpack.c.bf16 %v1379_v14, %v1379_v14 }
 0x2b0   :  { %1771 = vmatmul.mubr.msk.bf16.vlgmr.msra.gmra.mxu1 %vm643_vm2, %v1380_v16 }
 0x370   :  { %v1441_v18 = vpop.f32.mrf.mxu1 }
 0x371   :  { %v1442_v19 = vadd.f32 %v1583_v17, %v1441_v18 }
 0x372   :  { %v1772_v20 = vpop.f32.mrf.mxu1 }
 0x373   :  { %1447 = vst [vmem:[%s2294_s9] sm:$0xff] %v1442_v19 }
 0x374   :  { %v1444_v21 = vpop.f32.mrf.mxu1 }
 0x376   :  { %v1773_v22 = vpop.f32.mrf.mxu1 }

</bundles_post_ra>
